<compile_context>
chip_gen: v6e
topology: v6e:2x2x1
jax: 0.10.0
libtpu: 0.0.40
codegen_flags: <defaults>
</compile_context>

<pallas_src>
import functools

import jax
import jax.numpy as jnp
from jax import lax
from jax.experimental import pallas as pl
from jax.experimental.pallas import tpu as pltpu


def ann_kernel(pk_ref, sc_ref, w1_ref, b1_ref, wfc_ref, bfc_ref, rep_ref,
               *, D, EP, H, inv_n, cdt):
    TB, L, KP = pk_ref.shape
    OUT_W = rep_ref.shape[-1]
    f32 = jnp.float32

    mask = sc_ref[:, :, 0:1]                      # (TB, L, 1) f32, {0,1}
    onehot = sc_ref[:, :, 1:2]                    # (TB, L, 1) f32, {0,1}
    ent_att = sc_ref[:, :, 2:3]                   # (TB, L, 1) f32

    # Masked lane-packed tokens [w | e_pad | w]; mask is 0/1 so the bf16 multiply is exact.
    pk = pk_ref[...] * mask.astype(pk_ref.dtype)  # (TB, L, KP) bf16

    # Fused f_w / f_e: one bf16 MXU matmul over every token (f32 accumulation).  Rows of W1
    # outside [0, D) are zero, so the entity / anchor-copy lanes contribute nothing.
    x = jnp.dot(pk.reshape(TB * L, KP), w1_ref[...],
                preferred_element_type=f32) + b1_ref[...]              # (TB*L, W1_N) f32
    h = jnp.tanh(x.astype(cdt))                   # bf16 tanh on v6e/v7x, f32 on v5e

    w_bar = h[:, :H].reshape(TB, L, H)            # tanh(w @ W_w + b_w) per token
    fe_all = h[:, H:H + EP].reshape(TB, L, EP)    # tanh(w @ W_e + b_e) per token (pad cols = 0)

    # select_anchor via the one-hot (exactly one 1 per row -> exact even in bf16).
    oh = onehot.astype(cdt)
    anchor_w_bar = jnp.sum(oh * w_bar, axis=1, keepdims=True)          # (TB, 1, H)
    anchor_e = jnp.sum(oh * fe_all, axis=1, keepdims=True)             # (TB, 1, EP)

    # attention(anchor, emb): lane reduce per token, then per-row softmax in f32.
    # The per-row max cancels exactly in the normalisation (reference subtracts a global max).
    s_w = jnp.sum(w_bar * anchor_w_bar, axis=-1, keepdims=True).astype(f32)              # (TB, L, 1)
    s_e = jnp.sum(pk[:, :, D:D + EP] * anchor_e, axis=-1, keepdims=True).astype(f32)     # (TB, L, 1)
    exp_w = jnp.exp(s_w - jnp.max(s_w, axis=1, keepdims=True))
    exp_e = jnp.exp(s_e - jnp.max(s_e, axis=1, keepdims=True))
    alpha = (exp_w * (1.0 / jnp.sum(exp_w, axis=1, keepdims=True))
             + exp_e * (1.0 / jnp.sum(exp_e, axis=1, keepdims=True)))  # (TB, L, 1) f32, exact recip

    # Fused context/anchor reduce: lanes [0, D+EP) weighted by alpha (-> c_w | c_e),
    # lanes [D+EP, KP) weighted by the one-hot (-> anchor_w); matches the Wfc row packing.
    lane = lax.broadcasted_iota(jnp.int32, (TB, L, KP), 2)
    blend = jnp.where(lane < D + EP, alpha.astype(cdt), oh)            # (TB, L, KP)
    lhs = jnp.sum(blend * pk, axis=1)                                  # (TB, KP)

    # Fused fc in one bf16 MXU matmul (cols >= H of Wfc / bfc are zero).
    # TODO(synk): nn.Dropout(0.5) is stochastic at train time; eval-mode identity is used.
    slab = jnp.tanh(jnp.dot(lhs.astype(jnp.bfloat16), wfc_ref[...],
                            preferred_element_type=f32) + bfc_ref[...])  # (TB, OUT_W) f32

    # MSE(alpha, entity_attention) partial (pre-scaled by 1/(B*L)), folded into the lane-dense
    # output slab at [row 0, col H] (that slot is guaranteed to be 0 by construction).
    diff = alpha - ent_att
    loss_part = jnp.sum(diff * diff) * inv_n
    rows = lax.broadcasted_iota(jnp.int32, (TB, OUT_W), 0)
    cols = lax.broadcasted_iota(jnp.int32, (TB, OUT_W), 1)
    rep_ref[...] = slab + jnp.where((rows == 0) & (cols == H), loss_part, 0.0)


def _round_up(x, m):
    return ((x + m - 1) // m) * m


def _elementwise_dtype():
    """bf16 elementwise/tanh math on chips with a bf16 VPU+EUP (v6e, v7x); f32 otherwise."""
    try:
        kind = jax.devices()[0].device_kind.lower()
    except Exception:
        return jnp.float32
    return jnp.bfloat16 if any(t in kind for t in ("v6", "v7", "7x")) else jnp.float32


def _pick_block_b(B, L, KP, W1_N, OUT_W):
    """Largest divisor of B that fills the MXU M-dim without blowing the VMEM budget."""
    # Rough per-batch-element live VMEM: double-buffered operands + f32 working set.
    per_b = (2 * L * KP * 2          # packed token slab (bf16, double-buffered)
             + 2 * L * 8 * 4         # scalar sideband (f32, double-buffered)
             + 2 * OUT_W * 4         # output slab (f32, double-buffered)
             + 6 * L * W1_N * 4)     # h / blend / products working set (f32 upper bound)
    budget = 12 * (1 << 20)          # stays under v5e's 16 MiB default scoped VMEM
    target = min(max(256, (2048 + L - 1) // L),   # >= ~2048 token rows / 256 fc rows per step
                 max(1, budget // per_b))
    if B > target:
        # keep >= 4 grid steps for pipelining / megacore when that still leaves >= 128 MXU rows
        target = min(target, max(128, B // 4))
    tb = 1
    for d in range(1, min(B, target) + 1):
        if B % d == 0:
            tb = d
    return tb


def ann_forward(w, e, mask, onehot, ent_att, params, *, block_b=None, elementwise_dtype=None):
    B, L, D = w.shape
    H = params["b_w"].shape[-1]
    E = params["W_e"].shape[-1]

    KP = _round_up(2 * D + E, 128)        # packed token lane width == fc contraction dim
    EP = KP - 2 * D                       # padded entity width (>= E)
    W1_N = _round_up(H + EP, 128)         # fused f_w/f_e output width
    OUT_W = _round_up(H + 1, 128)         # lane-dense rep slab (+1 slot for the loss)

    f32, bf16 = jnp.float32, jnp.bfloat16
    cdt = elementwise_dtype if elementwise_dtype is not None else _elementwise_dtype()

    # Packed f_w/f_e weight, zero-extended to KP input rows so the packed slab feeds it
    # directly: rows [0, D) carry W_w (cols [0, H)) and W_e (cols [H, H+E)); rest zero.
    W1 = (jnp.zeros((KP, W1_N), f32)
          .at[:D, :H].set(params["W_w"])
          .at[:D, H:H + E].set(params["W_e"])).astype(bf16)
    b1 = (jnp.zeros((1, W1_N), f32)
          .at[:, :H].set(params["b_w"])
          .at[:, H:H + E].set(params["b_e"]))

    # Packed fc weight: rows [0,D)=W_fc_w, [D,D+E)=W_fc_e, [D+EP,D+EP+D)=W_fc_a; cols >= H zero.
    Wfc = (jnp.zeros((KP, OUT_W), f32)
           .at[:D, :H].set(params["W_fc_w"])
           .at[D:D + E, :H].set(params["W_fc_e"])
           .at[D + EP:D + EP + D, :H].set(params["W_fc_a"])).astype(bf16)
    bfc = jnp.zeros((1, OUT_W), f32).at[:, :H].set(params["b_fc"])

    # Lane-dense packed token slab [w | e (zero-padded to EP) | w], shipped as bf16.
    packed = (jnp.zeros((B, L, KP), f32)
              .at[:, :, :D].set(w)
              .at[:, :, D:D + E].set(e)
              .at[:, :, D + EP:D + EP + D].set(w)).astype(bf16)

    # Per-token scalar sideband: lane 0 = mask, 1 = anchor one-hot, 2 = attention target.
    scal = (jnp.zeros((B, L, 8), f32)
            .at[:, :, 0].set(mask)
            .at[:, :, 1].set(onehot)
            .at[:, :, 2].set(ent_att))

    if block_b is not None:
        TB = block_b
        assert B % TB == 0, "batch must be divisible by the requested batch block"
    else:
        TB = _pick_block_b(B, L, KP, W1_N, OUT_W)
    nb = B // TB
    inv_n = 1.0 / float(B * L)

    kernel = functools.partial(ann_kernel, D=D, EP=EP, H=H, inv_n=inv_n, cdt=cdt)

    padded = pl.pallas_call(
        kernel,
        out_shape=jax.ShapeDtypeStruct((B, OUT_W), f32),
        grid=(nb,),
        in_specs=[
            pl.BlockSpec((TB, L, KP), lambda i: (i, 0, 0)),   # packed tokens (bf16)
            pl.BlockSpec((TB, L, 8), lambda i: (i, 0, 0)),    # mask | one-hot | target
            pl.BlockSpec((KP, W1_N), lambda i: (0, 0)),       # packed W_w|W_e (bf16, resident)
            pl.BlockSpec((1, W1_N), lambda i: (0, 0)),        # packed b_w|b_e
            pl.BlockSpec((KP, OUT_W), lambda i: (0, 0)),      # packed fc weight (bf16, resident)
            pl.BlockSpec((1, OUT_W), lambda i: (0, 0)),       # packed fc bias
        ],
        out_specs=pl.BlockSpec((TB, OUT_W), lambda i: (i, 0)),
        compiler_params=pltpu.CompilerParams(dimension_semantics=("parallel",)),
    )(packed, scal, W1, b1, Wfc, bfc)

    rep = padded[:, :H]
    loss = jnp.sum(padded[0::TB, H])    # per-block partials, already scaled by 1/(B*L)
    return {"embedding": rep, "attention_loss": loss}


def reference_forward(w, e, mask, onehot, ent_att, p):
    """Plain-JAX f32 reference mirroring the PyTorch forward (eval-mode dropout)."""
    m = mask[:, :, None]
    w = w * m
    e = e * m
    oh = onehot[:, :, None]
    B, L, D = w.shape
    w_bar = jnp.tanh(w.reshape(B * L, D) @ p["W_w"] + p["b_w"]).reshape(B, L, -1)
    anchor_w = jnp.sum(oh * w, axis=1)
    anchor_w_bar = jnp.sum(oh * w_bar, axis=1)
    anchor_e = jnp.tanh(anchor_w @ p["W_e"] + p["b_e"])

    def attn(anchor, emb):
        s = jnp.sum(emb * anchor[:, None, :], axis=-1)
        s = jnp.exp(s - jnp.max(s))
        return s / jnp.sum(s, axis=1, keepdims=True)

    alpha = attn(anchor_w_bar, w_bar) + attn(anchor_e, e)
    c_w = jnp.sum(alpha[:, :, None] * w, axis=1)
    c_e = jnp.sum(alpha[:, :, None] * e, axis=1)
    rep = jnp.tanh(c_w @ p["W_fc_w"] + c_e @ p["W_fc_e"]
                   + anchor_w @ p["W_fc_a"] + p["b_fc"])
    loss = jnp.mean((alpha - ent_att) ** 2)
    return rep, loss


def make_example(key, B, L, word_table, entity_table):
    """Deterministic inputs: token / entity ids, length mask, anchor one-hot, target attention."""
    V, NE = word_table.shape[0], entity_table.shape[0]
    k = jax.random.split(key, 5)
    indices = jax.random.randint(k[0], (B, L), 0, V)
    entity_indices = jax.random.randint(k[1], (B, L), 0, NE)
    lengths = jax.random.randint(k[2], (B,), L // 2, L + 1)
    mask = (jnp.arange(L)[None, :] < lengths[:, None]).astype(jnp.float32)          # (B, L)
    anchor_index = jax.random.randint(k[3], (B,), 0, L // 2)                         # in valid span
    entity_attention = jax.nn.softmax(jax.random.normal(k[4], (B, L)), axis=-1)
    w = word_table[indices].astype(jnp.float32)                                      # (B, L, D)
    e = entity_table[entity_indices].astype(jnp.float32)                             # (B, L, E)
    onehot = (jnp.arange(L)[None, :] == anchor_index[:, None]).astype(jnp.float32)   # (B, L)
    return w, e, mask, onehot, entity_attention


if __name__ == "__main__":
    # Small, module-consistent sizes.
    B, L = 2, 8               # batch, sequence length
    V = 200                   # word vocab size
    D = 32                    # embedding_size
    H = 32                    # args.hidden_size
    E = 50                    # entity_size (fixed in module)
    NUM_ENTITIES = 100        # entity vocab size (fixed in module)

    key = jax.random.PRNGKey(0)
    keys = jax.random.split(key, 10)

    # Deterministic "checkpoint": embedding tables + linear weights/biases.
    word_table = jax.random.normal(keys[0], (V, D), jnp.float32) * 0.1
    entity_table = jax.random.normal(keys[1], (NUM_ENTITIES, E), jnp.float32) * 0.1
    params = {
        "W_w": jax.random.normal(keys[2], (D, H), jnp.float32) * (1.0 / jnp.sqrt(D)),
        "b_w": jnp.full((1, H), 0.01, jnp.float32),
        "W_e": jax.random.normal(keys[3], (D, E), jnp.float32) * (1.0 / jnp.sqrt(D)),
        "b_e": jnp.full((1, E), 0.01, jnp.float32),
        "W_fc_w": jax.random.normal(keys[4], (D, H), jnp.float32) * (1.0 / jnp.sqrt(2 * D + E)),
        "W_fc_e": jax.random.normal(keys[5], (E, H), jnp.float32) * (1.0 / jnp.sqrt(2 * D + E)),
        "W_fc_a": jax.random.normal(keys[6], (D, H), jnp.float32) * (1.0 / jnp.sqrt(2 * D + E)),
        "b_fc": jnp.full((1, H), 0.01, jnp.float32),
    }

    def run_and_check(batch, kseed):
        w, e, mask, onehot, ent_att = make_example(kseed, batch, L, word_table, entity_table)
        out = ann_forward(w, e, mask, onehot, ent_att, params)
        jax.block_until_ready(out)
        # Cross-check against a plain-JAX f32 reference (kernel uses bf16 MXU inputs with f32
        # accumulation, and bf16 tanh/score math on v6e/v7x -> relaxed tolerances).
        ref_rep, ref_loss = reference_forward(w, e, mask, onehot, ent_att, params)
        assert out["embedding"].shape == ref_rep.shape
        assert jnp.allclose(out["embedding"], ref_rep, atol=1e-2, rtol=1e-2), \
            float(jnp.max(jnp.abs(out["embedding"] - ref_rep)))
        assert jnp.allclose(out["attention_loss"], ref_loss, atol=2e-3, rtol=5e-2), \
            (float(out["attention_loss"]), float(ref_loss))

    run_and_check(B, keys[7])      # tiny, module-consistent shapes (single grid step)
    run_and_check(512, keys[8])    # larger batch: multi-block pipelined path (TB=128, nb=4)

    print("KERNEL_OK")
</pallas_src>

<mosaic_0001>
module attributes {stable_mosaic.version = 11 : i64} {
  func.func @ann_kernel(%arg0: i32, %arg1: memref<2x8x128xbf16, #tpu.memory_space<vmem>>, %arg2: memref<2x8x8xf32, #tpu.memory_space<vmem>>, %arg3: memref<128x128xbf16, #tpu.memory_space<vmem>>, %arg4: memref<1x128xf32, #tpu.memory_space<vmem>>, %arg5: memref<128x128xbf16, #tpu.memory_space<vmem>>, %arg6: memref<1x128xf32, #tpu.memory_space<vmem>>, %arg7: memref<2x128xf32, #tpu.memory_space<vmem>>) attributes {dimension_semantics = [#tpu.dimension_semantics<parallel>], iteration_bounds = array<i64: 1>, scalar_prefetch = 0 : i64, scratch_operands = 0 : i64, tpu.core_type = #tpu.core_type<tc>, window_params = [{transform_indices = @transform_0, window_bounds = array<i64: 2, 8, 128>}, {transform_indices = @transform_1, window_bounds = array<i64: 2, 8, 8>}, {pipeline_mode = #tpu.pipeline_mode<synchronous>, transform_indices = @transform_2, window_bounds = array<i64: 128, 128>}, {pipeline_mode = #tpu.pipeline_mode<synchronous>, transform_indices = @transform_3, window_bounds = array<i64: 1, 128>}, {pipeline_mode = #tpu.pipeline_mode<synchronous>, transform_indices = @transform_4, window_bounds = array<i64: 128, 128>}, {pipeline_mode = #tpu.pipeline_mode<synchronous>, transform_indices = @transform_5, window_bounds = array<i64: 1, 128>}, {transform_indices = @transform_6, window_bounds = array<i64: 2, 128>}]} {
    %c0 = arith.constant 0 : index
    %c0_0 = arith.constant 0 : index
    %c0_1 = arith.constant 0 : index
    %0 = vector.load %arg2[%c0, %c0_0, %c0_1] : memref<2x8x8xf32, #tpu.memory_space<vmem>>, vector<2x8x1xf32>
    %c0_2 = arith.constant 0 : index
    %c0_3 = arith.constant 0 : index
    %c1 = arith.constant 1 : index
    %1 = vector.load %arg2[%c0_2, %c0_3, %c1] : memref<2x8x8xf32, #tpu.memory_space<vmem>>, vector<2x8x1xf32>
    %c0_4 = arith.constant 0 : index
    %c0_5 = arith.constant 0 : index
    %c2 = arith.constant 2 : index
    %2 = vector.load %arg2[%c0_4, %c0_5, %c2] : memref<2x8x8xf32, #tpu.memory_space<vmem>>, vector<2x8x1xf32>
    %c0_6 = arith.constant 0 : index
    %c0_7 = arith.constant 0 : index
    %c0_8 = arith.constant 0 : index
    %3 = vector.load %arg1[%c0_6, %c0_7, %c0_8] : memref<2x8x128xbf16, #tpu.memory_space<vmem>>, vector<2x8x128xbf16>
    %4 = arith.truncf %0 : vector<2x8x1xf32> to vector<2x8x1xbf16>
    %5 = vector.broadcast %4 : vector<2x8x1xbf16> to vector<2x8x128xbf16>
    %6 = arith.mulf %3, %5 : vector<2x8x128xbf16>
    %7 = vector.shape_cast %6 : vector<2x8x128xbf16> to vector<16x128xbf16>
    %c0_9 = arith.constant 0 : index
    %c0_10 = arith.constant 0 : index
    %8 = vector.load %arg3[%c0_9, %c0_10] : memref<128x128xbf16, #tpu.memory_space<vmem>>, vector<128x128xbf16>
    %cst = arith.constant dense<0.000000e+00> : vector<16x128xf32>
    %9 = tpu.matmul %7, %8, %cst {dimension_numbers = #tpu.dot_dimension_numbers<[1], [0], [0], [1], [0, 0, 1, 1], [], []>} : vector<16x128xbf16>, vector<128x128xbf16>, vector<16x128xf32> -> vector<16x128xf32>
    %c0_11 = arith.constant 0 : index
    %c0_12 = arith.constant 0 : index
    %10 = vector.load %arg4[%c0_11, %c0_12] : memref<1x128xf32, #tpu.memory_space<vmem>>, vector<1x128xf32>
    %11 = vector.broadcast %10 : vector<1x128xf32> to vector<16x128xf32>
    %12 = arith.addf %9, %11 : vector<16x128xf32>
    %13 = math.tanh %12 : vector<16x128xf32>
    %14 = vector.extract_strided_slice %13 {offsets = [0, 0], sizes = [16, 32], strides = [1, 1]} : vector<16x128xf32> to vector<16x32xf32>
    %15 = vector.shape_cast %14 : vector<16x32xf32> to vector<2x8x32xf32>
    %16 = vector.extract_strided_slice %13 {offsets = [0, 32], sizes = [16, 64], strides = [1, 1]} : vector<16x128xf32> to vector<16x64xf32>
    %17 = vector.shape_cast %16 : vector<16x64xf32> to vector<2x8x64xf32>
    %18 = vector.broadcast %1 : vector<2x8x1xf32> to vector<2x8x32xf32>
    %19 = arith.mulf %18, %15 : vector<2x8x32xf32>
    %cst_13 = arith.constant dense<0.000000e+00> : vector<2x32xf32>
    %20 = vector.multi_reduction <add>, %19, %cst_13 [1] : vector<2x8x32xf32> to vector<2x32xf32>
    %21 = vector.shape_cast %20 : vector<2x32xf32> to vector<2x1x32xf32>
    %22 = vector.broadcast %1 : vector<2x8x1xf32> to vector<2x8x64xf32>
    %23 = arith.mulf %22, %17 : vector<2x8x64xf32>
    %cst_14 = arith.constant dense<0.000000e+00> : vector<2x64xf32>
    %24 = vector.multi_reduction <add>, %23, %cst_14 [1] : vector<2x8x64xf32> to vector<2x64xf32>
    %25 = vector.shape_cast %24 : vector<2x64xf32> to vector<2x1x64xf32>
    %26 = vector.broadcast %21 : vector<2x1x32xf32> to vector<2x8x32xf32>
    %27 = arith.mulf %15, %26 : vector<2x8x32xf32>
    %cst_15 = arith.constant dense<0.000000e+00> : vector<2x8xf32>
    %28 = vector.multi_reduction <add>, %27, %cst_15 [2] : vector<2x8x32xf32> to vector<2x8xf32>
    %29 = vector.shape_cast %28 : vector<2x8xf32> to vector<2x8x1xf32>
    %30 = vector.extract_strided_slice %6 {offsets = [0, 0, 32], sizes = [2, 8, 64], strides = [1, 1, 1]} : vector<2x8x128xbf16> to vector<2x8x64xbf16>
    %31 = arith.extf %30 : vector<2x8x64xbf16> to vector<2x8x64xf32>
    %32 = vector.broadcast %25 : vector<2x1x64xf32> to vector<2x8x64xf32>
    %33 = arith.mulf %31, %32 : vector<2x8x64xf32>
    %cst_16 = arith.constant dense<0.000000e+00> : vector<2x8xf32>
    %34 = vector.multi_reduction <add>, %33, %cst_16 [2] : vector<2x8x64xf32> to vector<2x8xf32>
    %35 = vector.shape_cast %34 : vector<2x8xf32> to vector<2x8x1xf32>
    %cst_17 = arith.constant dense<0xFF800000> : vector<2x1xf32>
    %36 = vector.multi_reduction <maximumf>, %29, %cst_17 [1] : vector<2x8x1xf32> to vector<2x1xf32>
    %37 = vector.shape_cast %36 : vector<2x1xf32> to vector<2x1x1xf32>
    %38 = vector.broadcast %37 : vector<2x1x1xf32> to vector<2x8x1xf32>
    %39 = arith.subf %29, %38 : vector<2x8x1xf32>
    %40 = math.exp %39 : vector<2x8x1xf32>
    %cst_18 = arith.constant dense<0xFF800000> : vector<2x1xf32>
    %41 = vector.multi_reduction <maximumf>, %35, %cst_18 [1] : vector<2x8x1xf32> to vector<2x1xf32>
    %42 = vector.shape_cast %41 : vector<2x1xf32> to vector<2x1x1xf32>
    %43 = vector.broadcast %42 : vector<2x1x1xf32> to vector<2x8x1xf32>
    %44 = arith.subf %35, %43 : vector<2x8x1xf32>
    %45 = math.exp %44 : vector<2x8x1xf32>
    %cst_19 = arith.constant dense<0.000000e+00> : vector<2x1xf32>
    %46 = vector.multi_reduction <add>, %40, %cst_19 [1] : vector<2x8x1xf32> to vector<2x1xf32>
    %47 = vector.shape_cast %46 : vector<2x1xf32> to vector<2x1x1xf32>
    %cst_20 = arith.constant 1.000000e+00 : f32
    %48 = vector.broadcast %cst_20 : f32 to vector<2x1x1xf32>
    %49 = arith.divf %48, %47 : vector<2x1x1xf32>
    %50 = vector.broadcast %49 : vector<2x1x1xf32> to vector<2x8x1xf32>
    %51 = arith.mulf %40, %50 : vector<2x8x1xf32>
    %cst_21 = arith.constant dense<0.000000e+00> : vector<2x1xf32>
    %52 = vector.multi_reduction <add>, %45, %cst_21 [1] : vector<2x8x1xf32> to vector<2x1xf32>
    %53 = vector.shape_cast %52 : vector<2x1xf32> to vector<2x1x1xf32>
    %cst_22 = arith.constant 1.000000e+00 : f32
    %54 = vector.broadcast %cst_22 : f32 to vector<2x1x1xf32>
    %55 = arith.divf %54, %53 : vector<2x1x1xf32>
    %56 = vector.broadcast %55 : vector<2x1x1xf32> to vector<2x8x1xf32>
    %57 = arith.mulf %45, %56 : vector<2x8x1xf32>
    %58 = arith.addf %51, %57 : vector<2x8x1xf32>
    %59 = tpu.iota {dimensions = array<i32: 2>} : vector<2x8x128xi32>
    %c96_i32 = arith.constant 96 : i32
    %60 = vector.broadcast %c96_i32 : i32 to vector<2x8x128xi32>
    %61 = arith.cmpi slt, %59, %60 : vector<2x8x128xi32>
    %62 = vector.shape_cast %58 : vector<2x8x1xf32> to vector<2x8x1xf32>
    %63 = vector.broadcast %62 : vector<2x8x1xf32> to vector<2x8x128xf32>
    %64 = vector.shape_cast %1 : vector<2x8x1xf32> to vector<2x8x1xf32>
    %65 = vector.broadcast %64 : vector<2x8x1xf32> to vector<2x8x128xf32>
    %66 = arith.select %61, %63, %65 : vector<2x8x128xi1>, vector<2x8x128xf32>
    %67 = arith.extf %6 : vector<2x8x128xbf16> to vector<2x8x128xf32>
    %68 = arith.mulf %66, %67 : vector<2x8x128xf32>
    %cst_23 = arith.constant dense<0.000000e+00> : vector<2x128xf32>
    %69 = vector.multi_reduction <add>, %68, %cst_23 [1] : vector<2x8x128xf32> to vector<2x128xf32>
    %70 = arith.truncf %69 : vector<2x128xf32> to vector<2x128xbf16>
    %c0_24 = arith.constant 0 : index
    %c0_25 = arith.constant 0 : index
    %71 = vector.load %arg5[%c0_24, %c0_25] : memref<128x128xbf16, #tpu.memory_space<vmem>>, vector<128x128xbf16>
    %cst_26 = arith.constant dense<0.000000e+00> : vector<2x128xf32>
    %72 = tpu.matmul %70, %71, %cst_26 {dimension_numbers = #tpu.dot_dimension_numbers<[1], [0], [0], [1], [0, 0, 1, 1], [], []>} : vector<2x128xbf16>, vector<128x128xbf16>, vector<2x128xf32> -> vector<2x128xf32>
    %c0_27 = arith.constant 0 : index
    %c0_28 = arith.constant 0 : index
    %73 = vector.load %arg6[%c0_27, %c0_28] : memref<1x128xf32, #tpu.memory_space<vmem>>, vector<1x128xf32>
    %74 = vector.broadcast %73 : vector<1x128xf32> to vector<2x128xf32>
    %75 = arith.addf %72, %74 : vector<2x128xf32>
    %76 = math.tanh %75 : vector<2x128xf32>
    %77 = arith.subf %58, %2 : vector<2x8x1xf32>
    %78 = arith.mulf %77, %77 : vector<2x8x1xf32>
    %79 = vector.shape_cast %78 : vector<2x8x1xf32> to vector<1x2x8x1xf32>
    %cst_29 = arith.constant dense<0.000000e+00> : vector<1xf32>
    %80 = vector.multi_reduction <add>, %79, %cst_29 [1, 2, 3] : vector<1x2x8x1xf32> to vector<1xf32>
    %81 = vector.shape_cast %80 : vector<1xf32> to vector<1x1x1x1xf32>
    %82 = vector.extract %81[0, 0, 0, 0] : f32 from vector<1x1x1x1xf32>
    %cst_30 = arith.constant 6.250000e-02 : f32
    %83 = arith.mulf %82, %cst_30 : f32
    %84 = tpu.iota {dimensions = array<i32: 0>} : vector<2x128xi32>
    %85 = tpu.iota {dimensions = array<i32: 1>} : vector<2x128xi32>
    %c0_i32 = arith.constant 0 : i32
    %86 = vector.broadcast %c0_i32 : i32 to vector<2x128xi32>
    %87 = arith.cmpi eq, %84, %86 : vector<2x128xi32>
    %c32_i32 = arith.constant 32 : i32
    %88 = vector.broadcast %c32_i32 : i32 to vector<2x128xi32>
    %89 = arith.cmpi eq, %85, %88 : vector<2x128xi32>
    %90 = arith.andi %87, %89 : vector<2x128xi1>
    %cst_31 = arith.constant 0.000000e+00 : f32
    %91 = vector.broadcast %83 : f32 to vector<2x128xf32>
    %92 = vector.broadcast %cst_31 : f32 to vector<2x128xf32>
    %93 = arith.select %90, %91, %92 : vector<2x128xi1>, vector<2x128xf32>
    %94 = arith.addf %76, %93 : vector<2x128xf32>
    %c0_32 = arith.constant 0 : index
    %c0_33 = arith.constant 0 : index
    %95 = vector.load %arg7[%c0_32, %c0_33] : memref<2x128xf32, #tpu.memory_space<vmem>>, vector<2x128xf32>
    tpu.vector_store %arg7[%c0_32, %c0_33], %94 {strides = array<i32>} : memref<2x128xf32, #tpu.memory_space<vmem>>, vector<2x128xf32>,
    return
  }
  func.func @transform_0(%arg0: i32) -> (i32, i32, i32) {
    %c0_i32 = arith.constant 0 : i32
    %c0_i32_0 = arith.constant 0 : i32
    %c0_i32_1 = arith.constant 0 : i32
    return %arg0, %c0_i32, %c0_i32_0 : i32, i32, i32
  }
  func.func @transform_1(%arg0: i32) -> (i32, i32, i32) {
    %c0_i32 = arith.constant 0 : i32
    %c0_i32_0 = arith.constant 0 : i32
    %c0_i32_1 = arith.constant 0 : i32
    return %arg0, %c0_i32, %c0_i32_0 : i32, i32, i32
  }
  func.func @transform_2(%arg0: i32) -> (i32, i32) {
    %c0_i32 = arith.constant 0 : i32
    %c0_i32_0 = arith.constant 0 : i32
    %c0_i32_1 = arith.constant 0 : i32
    return %c0_i32, %c0_i32_0 : i32, i32
  }
  func.func @transform_3(%arg0: i32) -> (i32, i32) {
    %c0_i32 = arith.constant 0 : i32
    %c0_i32_0 = arith.constant 0 : i32
    %c0_i32_1 = arith.constant 0 : i32
    return %c0_i32, %c0_i32_0 : i32, i32
  }
  func.func @transform_4(%arg0: i32) -> (i32, i32) {
    %c0_i32 = arith.constant 0 : i32
    %c0_i32_0 = arith.constant 0 : i32
    %c0_i32_1 = arith.constant 0 : i32
    return %c0_i32, %c0_i32_0 : i32, i32
  }
  func.func @transform_5(%arg0: i32) -> (i32, i32) {
    %c0_i32 = arith.constant 0 : i32
    %c0_i32_0 = arith.constant 0 : i32
    %c0_i32_1 = arith.constant 0 : i32
    return %c0_i32, %c0_i32_0 : i32, i32
  }
  func.func @transform_6(%arg0: i32) -> (i32, i32) {
    %c0_i32 = arith.constant 0 : i32
    %c0_i32_0 = arith.constant 0 : i32
    return %arg0, %c0_i32 : i32, i32
  }
}

</mosaic_0001>

<bundles_post_ra>
// kernel: tpu_custom_call.1
= control target key start
LH: loop header
LB: loop body
LE: loop exit
PB: predicated region body
PF: predicated region fallthrough
CT: control target
= control target key end

     0   :  { %11 = vsyncpa [#allocation3], 0  ;;  %s932_s0 = inlined_call_operand.hbm [shape: bf16[2,8,128], index: 0, kind: input, shape index: {}]   ;;  %s933_s1 = inlined_call_operand.hbm [shape: f32[2,8,8], index: 1, kind: input, shape index: {}]   ;;  %s934_s2 = inlined_call_operand.hbm [shape: bf16[128,128], index: 2, kind: input, shape index: {}]   ;;  %s935_s3 = inlined_call_operand.vmem [shape: f32[1,128], index: 3, kind: input, shape index: {}]   ;;  %s936_s4 = inlined_call_operand.hbm [shape: bf16[128,128], index: 4, kind: input, shape index: {}]   ;;  %s937_s5 = inlined_call_operand.vmem [shape: f32[1,128], index: 5, kind: input, shape index: {}]   ;;  %s938_s6 = inlined_call_operand.hbm [shape: f32[2,128], index: 6, kind: output, shape index: {}]  }
   0x1   :  { %12 = vsyncpa [#allocation6], 0 }
   0x2   :  { %13 = vsyncpa [#allocation9], 0 }
   0x3   :  { %14 = vsyncpa [#allocation4], 0  ;;  %s797_s21 = smov [#allocation5]  }
   0x4   :  { %s32_s22 = sshll.u32 %s797_s21, 4  ;;  %s33_s22 = int_to_ptr.vmem [resolvable:$true] %s32_s22 }
   0x5   :  { %s697_s23 = scalar_lea.vmem %s33_s22, 256  ;;  %p702_p1 = scmp.lt.s32.totalorder %s33_s22, %s33_s22 }
   0x6   :  { %p698_p0 = scmp.ne.s32.totalorder %s33_s22, %s697_s23  ;;  %p703_p2 = scmp.lt.s32.totalorder %s697_s23, %s697_s23 }
   0x8   :  { %p704_p3 = por %p703_p2, %p702_p1 }
   0xa   :  { %p705_p4 = pnand %p704_p3, %p698_p0 }
   0xc   :  { %708 = shalt.err (!%p705_p4)
}
   0xd   :  { %s798_s24 = smov 128   ;;  %s799_s25 = smov 8  }
   0xe   :  { %38 = dma.hbm_to_vmem [thread:$0]  %s933_s1, 256, %s33_s22, [#allocation6], %s798_s24, %s798_s24, %s799_s25  }
   0xf   :  { %s800_s28 = smov [#allocation2]  }
  0x10   :  { %s20_s29 = sshll.u32 %s800_s28, 4  ;;  %s21_s29 = int_to_ptr.vmem [resolvable:$true] %s20_s29 }
  0x11   :  { %s717_s30 = scalar_lea.vmem %s21_s29, 128  ;;  %p722_p6 = scmp.lt.s32.totalorder %s21_s29, %s21_s29 }
  0x12   :  { %p718_p5 = scmp.ne.s32.totalorder %s21_s29, %s717_s30  ;;  %p723_p7 = scmp.lt.s32.totalorder %s717_s30, %s717_s30 }
  0x14   :  { %p724_p8 = por %p723_p7, %p722_p6 }
  0x16   :  { %p725_p9 = pnand %p724_p8, %p718_p5 }
  0x18   :  { %728 = shalt.err (!%p725_p9)
}
  0x19   :  { %s801_s7 = smov 64   ;;  %s802_s8 = smov 4  }
  0x1a   :  { %26 = dma.hbm_to_vmem [thread:$0]  %s932_s0, 128, %s21_s29, [#allocation3], %s801_s7, %s801_s7, %s802_s8  }
  0x1b   :  { %s803_s11 = smov [#allocation7]   ;;  %s804_s13 = smov [#allocation8]  }
  0x1c   :  { %s44_s12 = sshll.u32 %s803_s11, 4  ;;  %s58_s1 = sshll.u32 %s804_s13, 4  ;;  %s45_s12 = int_to_ptr.vmem [resolvable:$true] %s44_s12  ;;  %s59_s1 = int_to_ptr.vmem [resolvable:$true] %s58_s1 }
  0x1d   :  { %s737_s14 = scalar_lea.vmem %s45_s12, 1024  ;;  %p742_p11 = scmp.lt.s32.totalorder %s45_s12, %s45_s12 }
  0x1e   :  { %p738_p10 = scmp.ne.s32.totalorder %s45_s12, %s737_s14  ;;  %p743_p12 = scmp.lt.s32.totalorder %s737_s14, %s737_s14 }
  0x20   :  { %p744_p13 = por %p743_p12, %p742_p11 }
  0x22   :  { %p745_p0 = pnand %p744_p13, %p738_p10 }
  0x24   :  { %748 = shalt.err (!%p745_p0)
}
  0x25   :  { %50 = dma.hbm_to_vmem [thread:$0]  %s934_s2, 1024, %s45_s12, [#allocation6], %s801_s7, %s801_s7, %s802_s8  }
  0x26   :  { %s757_s17 = scalar_lea.vmem %s59_s1, 1024  ;;  %p762_p2 = scmp.lt.s32.totalorder %s59_s1, %s59_s1 }
  0x27   :  { %p758_p1 = scmp.ne.s32.totalorder %s59_s1, %s757_s17  ;;  %p763_p3 = scmp.lt.s32.totalorder %s757_s17, %s757_s17 }
  0x29   :  { %p764_p4 = por %p763_p3, %p762_p2 }
  0x2b   :  { %p765_p5 = pnand %p764_p4, %p758_p1 }
  0x2d   :  { %768 = shalt.err (!%p765_p5)
}
  0x2e   :  { %64 = dma.hbm_to_vmem [thread:$0]  %s936_s4, 1024, %s59_s1, [#allocation9], %s801_s7, %s801_s7, %s802_s8  }
  0x2f   :  { %789 = dma.done.wait [#allocation3], 128  }
  0x30   :  { %790 = vsyncadd [#allocation3], 4294967168 }
  0x31   :  { %791 = dma.done.wait [#allocation6], 1280  }
  0x32   :  { %792 = vsyncadd [#allocation6], 4294966016 }
  0x33   :  { %793 = dma.done.wait [#allocation9], 1024  }
  0x34   :  { %794 = vsyncadd [#allocation9], 4294966272  ;;  %v805_v0 = vmov 0   ;;  %v806_v1 = vmov 0.0   ;;  %v861_v2 = vld [vmem:[#allocation5] sm:$0xff]  ;;  %v863_v3 = vld [vmem:[#allocation5 + $0x8] sm:$0xff] }
  0x35   :  { %648 = vset.pattern.permute.xlu0 %v805_v0  ;;  %591 = vmatprep.subr.bf16.mxu0 %v806_v1  ;;  %v84_v4 = vpack.c.bf16 %v861_v2, %v861_v2  ;;  %v651_v5 = vld [vmem:[#allocation7 + $0x38] sm:$0xff]   ;;  %v85_v6 = vpack.c.bf16 %v863_v3, %v863_v3  ;;  %v652_v7 = vld [vmem:[#allocation7 + $0x30] sm:$0xff]   ;;  %vm807_vm0 = vmmov 0   ;;  %v653_v8 = vld [vmem:[#allocation7 + $0x28] sm:$0xff]   ;;  %v808_v9 = vmov 1   ;;  %s810_s19 = smov 126  }
  0x36   :  { %611 = vmatprep.subr.bf16.mxu1 %v806_v1  ;;  %592 = vmatpush3.bf16.msra.mxu0 %v651_v5  ;;  %v654_v10 = vld [vmem:[#allocation7 + $0x20] sm:$0xff]   ;;  %v655_v11 = vld [vmem:[#allocation7 + $0x18] sm:$0xff]   ;;  %v656_v12 = vld [vmem:[#allocation7 + $0x10] sm:$0xff]   ;;  %vm245_vm1 = vcmask 785664   ;;  %vm230_vm2 = vcmask 261120   ;;  %vm280_vm3 = vcmask 523264  }
  0x37   :  { %88 = vperm.xlu0 %648, %v84_v4   ;;  %593 = vmatprep.subr.bf16.mxu0 %v806_v1  ;;  %v657_v13 = vld [vmem:[#allocation7 + $0x8] sm:$0xff]   ;;  %v658_v14 = vld [vmem:[#allocation7] sm:$0xff]   ;;  %vm409_vm5 = vcmask 1041409   ;;  %vm514_vm6 = vcmask 7168   ;;  %s811_s24 = smov [#allocation10]  }
  0x38   :  { %607 = vmatprep.mubr.msk.bf16.mxu0 %vm807_vm0, %v806_v1  ;;  %627 = vmatprep.mubr.msk.bf16.mxu1 %vm807_vm0, %v806_v1  ;;  %v82_v16 = vld [vmem:[#allocation2] sm:$0xf]  ;;  %v83_v17 = vld [vmem:[#allocation2 + $0x4] sm:$0xf]  ;;  %s543_s25 = sshll.u32 %s811_s24, 4  ;;  %s544_s25 = int_to_ptr.vmem [resolvable:$true] %s543_s25 }
  0x39   :  { %649 = vset.pattern.permute.xlu1 %v808_v9  ;;  %v554_v22 = vld [vmem:[%s935_s3] ss:$0 sm:$0xff]  ;;  %s809_s3 = smov 96   ;;  %s769_s26 = scalar_lea.vmem %s544_s25, 32 }
  0x3a   :  { %594 = vmatpush3.bf16.msra.mxu0 %v652_v7  ;;  %220 = vperm.xlu1 %649, %v861_v2   ;;  %p770_p6 = scmp.ne.s32.totalorder %s544_s25, %s769_s26  ;;  %p774_p7 = scmp.lt.s32.totalorder %s544_s25, %s544_s25 }
  0x3b   :  { %93 = vperm.xlu0 %648, %v85_v6   ;;  %595 = vmatprep.subr.bf16.mxu0 %v806_v1  ;;  %p775_p8 = scmp.lt.s32.totalorder %s769_s26, %s769_s26 }
  0x3d   :  { %p776_p9 = por %p775_p8, %p774_p7 }
  0x3e   :  { %596 = vmatpush3.bf16.msra.mxu0 %v653_v8  ;;  %225 = vperm.xlu1 %649, %v863_v3  }
  0x3f   :  { %650 = vset.pattern.permute.xlu0 %v808_v9  ;;  %597 = vmatprep.subr.bf16.mxu0 %v806_v1  ;;  %p777_p10 = pnand %p776_p9, %p770_p6 }
  0x42   :  { %598 = vmatpush3.bf16.msra.mxu0 %v654_v10 }
  0x43   :  { %599 = vmatprep.subr.bf16.mxu0 %v806_v1 }
  0x46   :  { %600 = vmatpush3.bf16.msra.mxu0 %v655_v11 }
  0x47   :  { %601 = vmatprep.subr.bf16.mxu0 %v806_v1 }
  0x4a   :  { %602 = vmatpush3.bf16.msra.mxu0 %v656_v12 }
  0x4b   :  { %603 = vmatprep.subr.bf16.mxu0 %v806_v1 }
  0x4e   :  { %604 = vmatpush3.bf16.msra.mxu0 %v657_v13 }
  0x4f   :  { %605 = vmatprep.subr.bf16.mxu0 %v806_v1 }
  0x52   :  { %606 = vmatpush3.bf16.msra.mxu0 %v658_v14  ;;  %v659_v14 = vld [vmem:[#allocation8 + $0x38] sm:$0xff]  }
  0x53   :  { %612 = vmatpush3.bf16.msra.mxu1 %v659_v14 }
  0x54   :  { %613 = vmatprep.subr.bf16.mxu1 %v806_v1 }
  0xb2   :  { %v89_v15 = vpop.permute.xlu0 %88 }
  0xb3   :  { %v880_v19 = vmul.bf16 %v89_v15, %v82_v16  ;;  %v660_v15 = vld [vmem:[#allocation8 + $0x30] sm:$0xff]   ;;  %v661_v16 = vld [vmem:[#allocation8 + $0x28] sm:$0xff]  }
  0xb4   :  { %614 = vmatpush3.bf16.msra.mxu1 %v660_v15 }
  0xb5   :  { %v889_v29 = vpop.permute.xlu1 %220  ;;  %v268_v45 = vunpack.c.l.bf16 %v880_v19  ;;  %615 = vmatprep.subr.bf16.mxu1 %v806_v1 }
  0xb6   :  { %v94_v18 = vpop.permute.xlu0 %93 }
  0xb7   :  { %v882_v20 = vmul.bf16 %v94_v18, %v83_v17  ;;  %v662_v17 = vld [vmem:[#allocation8 + $0x20] sm:$0xff]   ;;  %v663_v18 = vld [vmem:[#allocation8 + $0x18] sm:$0xff]  }
  0xb8   :  { %616 = vmatpush3.bf16.msra.mxu1 %v661_v16 }
  0xb9   :  { %v555_v21 = vcombine.low %v880_v19, %v882_v20  ;;  %v892_v35 = vpop.permute.xlu1 %225  ;;  %v269_v51 = vunpack.c.l.bf16 %v882_v20  ;;  %617 = vmatprep.subr.bf16.mxu1 %v806_v1 }
  0xbb   :  { %608 = vmatmul.mubr.bf16.vlgmr.msra.gmra.mxu0 %v555_v21  ;;  %v664_v21 = vld [vmem:[#allocation8 + $0x10] sm:$0xff]  }
  0xbc   :  { %618 = vmatpush3.bf16.msra.mxu1 %v662_v17 }
  0xbd   :  { %619 = vmatprep.subr.bf16.mxu1 %v806_v1 }
  0xc0   :  { %620 = vmatpush3.bf16.msra.mxu1 %v663_v18 }
  0xc1   :  { %621 = vmatprep.subr.bf16.mxu1 %v806_v1 }
  0xc4   :  { %622 = vmatpush3.bf16.msra.mxu1 %v664_v21 }
  0xc5   :  { %623 = vmatprep.subr.bf16.mxu1 %v806_v1 }
 0x17b   :  { %v209_v23 = vpop.f32.mrf.mxu0 }
 0x17c   :  { %v210_v24 = vadd.f32 %v554_v22, %v209_v23  ;;  %v666_v23 = vld [vmem:[#allocation8] sm:$0xff]  }
 0x17d   :  { %v609_v25 = vpop.f32.mrf.mxu0 }
 0x17e   :  { %667 = vtanh.f32 %v210_v24 }
 0x17f   :  { %v212_v26 = vpop.f32.mrf.mxu0 }
 0x180   :  { %v213_v27 = vadd.f32 %v554_v22, %v212_v26  ;;  %v665_v22 = vld [vmem:[#allocation8 + $0x8] sm:$0xff]  }
 0x181   :  { %v610_v28 = vpop.f32.mrf.mxu0  ;;  %624 = vmatpush3.bf16.msra.mxu1 %v665_v22 }
 0x182   :  { %669 = vtanh.f32 %v213_v27  ;;  %625 = vmatprep.subr.bf16.mxu1 %v806_v1 }
 0x185   :  { %626 = vmatpush3.bf16.msra.mxu1 %v666_v23 }
 0x18b   :  { %v668_v30 = vpop.eup %667 }
 0x18c   :  { %v228_v31 = vmul.f32 %v668_v30, %v889_v29 }
 0x18e   :  { %v246_v32 = vsel %vm245_vm1, %v228_v31, 0.0  ;;  %v231_v50 = vsel %vm230_vm2, %v228_v31, 0.0 }
 0x18f   :  { %v670_v33 = vpop.eup %669  ;;  %v247_v34 = vrot.slane %v246_v32, 4  ;;  %v232_v53 = vrot.slane %v231_v50, 4 }
 0x190   :  { %v229_v36 = vmul.f32 %v670_v33, %v892_v35 }
 0x191   :  { %v248_v37 = vadd.f32 %v247_v34, %v246_v32  ;;  %v233_v55 = vadd.f32 %v232_v53, %v231_v50 }
 0x192   :  { %v253_v38 = vsel %vm245_vm1, %v229_v36, 0.0  ;;  %v238_v56 = vsel %vm230_vm2, %v229_v36, 0.0 }
 0x193   :  { %v249_v39 = vrot.slane %v248_v37, 2  ;;  %v254_v40 = vrot.slane %v253_v38, 4  ;;  %v234_v57 = vrot.slane %v233_v55, 2  ;;  %v239_v58 = vrot.slane %v238_v56, 4 }
 0x195   :  { %v250_v41 = vadd.f32 %v249_v39, %v248_v37  ;;  %v255_v42 = vadd.f32 %v254_v40, %v253_v38  ;;  %v235_v59 = vadd.f32 %v234_v57, %v233_v55  ;;  %v240_v60 = vadd.f32 %v239_v58, %v238_v56 }
 0x197   :  { %v256_v43 = vrot.slane %v255_v42, 2  ;;  %v251_v44 = vrot.slane %v250_v41, 1  ;;  %v236_v61 = vrot.slane %v235_v59, 1  ;;  %v241_v62 = vrot.slane %v240_v60, 2 }
 0x199   :  { %v257_v46 = vadd.f32 %v256_v43, %v255_v42  ;;  %v252_v47 = vadd.f32 %v251_v44, %v250_v41  ;;  %v237_v63 = vadd.f32 %v236_v61, %v235_v59  ;;  %v242_v0 = vadd.f32 %v241_v62, %v240_v60 }
 0x19b   :  { %v270_v48 = vmul.f32 %v268_v45, %v252_v47  ;;  %v258_v49 = vrot.slane %v257_v46, 1  ;;  %v260_v4 = vmul.f32 %v668_v30, %v237_v63  ;;  %v243_v5 = vrot.slane %v242_v0, 1 }
 0x19d   :  { %274 = vrot.lane.b32.xlu0 %v270_v48, %s809_s3  ;;  %v259_v52 = vadd.f32 %v258_v49, %v257_v46  ;;  %v262_v6 = vsel %vm230_vm2, %v260_v4, 0.0  ;;  %v244_v7 = vadd.f32 %v243_v5, %v242_v0 }
 0x19f   :  { %v271_v54 = vmul.f32 %v269_v51, %v259_v52  ;;  %v261_v8 = vmul.f32 %v670_v33, %v244_v7 }
 0x1a1   :  { %276 = vrot.lane.b32.xlu1 %v271_v54, %s809_s3  ;;  %v265_v9 = vsel %vm230_vm2, %v261_v8, 0.0 }
 0x1bc   :  { %263 = vadd.xlane.f32.xlu0 %v262_v6 }
 0x1c5   :  { %266 = vadd.xlane.f32.xlu1 %v265_v9 }
 0x20f   :  { %v275_v10 = vpop.permute.xlu0 %274 }
 0x210   :  { %v281_v11 = vsel %vm280_vm3, %v275_v10, 0.0 }
 0x211   :  { %282 = vadd.xlane.f32.xlu0 %v281_v11 }
 0x213   :  { %v277_v12 = vpop.permute.xlu1 %276 }
 0x214   :  { %v284_v13 = vsel %vm280_vm3, %v277_v12, 0.0 }
 0x215   :  { %285 = vadd.xlane.f32.xlu0 %v284_v13 }
 0x245   :  { %v264_v24 = vpop.xlane.xlu0 %263 }
 0x246   :  { %v287_v25 = vrot.slane %v264_v24, 4 }
 0x248   :  { %v288_v27 = vmax.f32 %v264_v24, %v287_v25 }
 0x24a   :  { %v289_v30 = vrot.slane %v288_v27, 2 }
 0x24c   :  { %v290_v32 = vmax.f32 %v288_v27, %v289_v30 }
 0x24e   :  { %v267_v26 = vpop.xlane.xlu1 %266  ;;  %v291_v34 = vrot.slane %v290_v32, 1 }
 0x24f   :  { %v293_v28 = vrot.slane %v267_v26, 4 }
 0x250   :  { %v292_v37 = vmax.f32 %v290_v32, %v291_v34 }
 0x251   :  { %v294_v31 = vmax.f32 %v267_v26, %v293_v28 }
 0x252   :  { %v299_v39 = vsub.f32 %v264_v24, %v292_v37 }
 0x253   :  { %v295_v33 = vrot.slane %v294_v31, 2 }
 0x254   :  { %v301_v41 = vmul.f32 1.442695, %v299_v39 }
 0x255   :  { %v296_v36 = vmax.f32 %v294_v31, %v295_v33  ;;  %v361_v33 = vlaneseq }
 0x256   :  { %671 = vpow2.f32 %v301_v41 }
 0x257   :  { %v297_v38 = vrot.slane %v296_v36, 1 }
 0x259   :  { %v298_v40 = vmax.f32 %v296_v36, %v297_v38  ;;  %v913_v36 = vand.u32 127, %v361_v33 }
 0x25b   :  { %v300_v42 = vsub.f32 %v267_v26, %v298_v40  ;;  %vm363_vm4 = vcmp.lt.s32.totalorder %v913_v36, 96  ;;  %vm531_vm8 = vcmp.eq.s32.totalorder %v913_v36, 32 }
 0x25d   :  { %v303_v1 = vmul.f32 1.442695, %v300_v42 }
 0x25f   :  { %673 = vpow2.f32 %v303_v1 }
 0x263   :  { %v672_v59 = vpop.eup %671 }
 0x264   :  { %v323_v63 = vrot.slane %v672_v59, 4 }
 0x266   :  { %v324_v5 = vadd.f32 %v672_v59, %v323_v63 }
 0x268   :  { %v325_v7 = vrot.slane %v324_v5, 2 }
 0x26a   :  { %v326_v9 = vadd.f32 %v325_v7, %v324_v5 }
 0x26c   :  { %v674_v0 = vpop.eup %673  ;;  %v327_v13 = vrot.slane %v326_v9, 1 }
 0x26d   :  { %v329_v6 = vrot.slane %v674_v0, 4 }
 0x26e   :  { %v328_v21 = vadd.f32 %v327_v13, %v326_v9 }
 0x26f   :  { %v330_v8 = vadd.f32 %v674_v0, %v329_v6 }
 0x271   :  { %v331_v10 = vrot.slane %v330_v8, 2 }
 0x273   :  { %v332_v15 = vadd.f32 %v331_v10, %v330_v8 }
 0x275   :  { %v333_v23 = vrot.slane %v332_v15, 1 }
 0x277   :  { %v334_v28 = vadd.f32 %v333_v23, %v332_v15 }
 0x29a   :  { %v283_v43 = vpop.xlane.xlu0 %282 }
 0x29b   :  { %v305_v44 = vrot.slane %v283_v43, 4 }
 0x29d   :  { %v306_v46 = vmax.f32 %v283_v43, %v305_v44 }
 0x29e   :  { %v286_v47 = vpop.xlane.xlu0 %285 }
 0x29f   :  { %v307_v48 = vrot.slane %v306_v46, 2  ;;  %v311_v49 = vrot.slane %v286_v47, 4 }
 0x2a1   :  { %v308_v50 = vmax.f32 %v306_v46, %v307_v48  ;;  %v312_v52 = vmax.f32 %v286_v47, %v311_v49 }
 0x2a3   :  { %v309_v53 = vrot.slane %v308_v50, 1  ;;  %v313_v54 = vrot.slane %v312_v52, 2 }
 0x2a5   :  { %v310_v55 = vmax.f32 %v308_v50, %v309_v53  ;;  %v314_v56 = vmax.f32 %v312_v52, %v313_v54 }
 0x2a7   :  { %v317_v57 = vsub.f32 %v283_v43, %v310_v55  ;;  %v315_v58 = vrot.slane %v314_v56, 1 }
 0x2a9   :  { %v319_v60 = vmul.f32 1.442695, %v317_v57  ;;  %v316_v61 = vmax.f32 %v314_v56, %v315_v58 }
 0x2ab   :  { %675 = vpow2.f32 %v319_v60  ;;  %v318_v62 = vsub.f32 %v286_v47, %v316_v61 }
 0x2ad   :  { %v321_v4 = vmul.f32 1.442695, %v318_v62 }
 0x2af   :  { %677 = vpow2.f32 %v321_v4 }
 0x2b0   :  { %679 = vrcp.f32 %v328_v21 }
 0x2b8   :  { %v676_v11 = vpop.eup %675 }
 0x2b9   :  { %v341_v12 = vrot.slane %v676_v11, 4 }
 0x2bb   :  { %v342_v14 = vadd.f32 %v676_v11, %v341_v12 }
 0x2bc   :  { %v678_v16 = vpop.eup %677 }
 0x2bd   :  { %v343_v17 = vrot.slane %v342_v14, 2  ;;  %v347_v18 = vrot.slane %v678_v16, 4  ;;  %v680_v34 = vpop.eup %679 }
 0x2be   :  { %v339_v38 = vmul.f32 %v680_v34, %v672_v59 }
 0x2bf   :  { %v344_v22 = vadd.f32 %v343_v17, %v342_v14  ;;  %v348_v24 = vadd.f32 %v678_v16, %v347_v18 }
 0x2c1   :  { %v345_v25 = vrot.slane %v344_v22, 1  ;;  %v349_v26 = vrot.slane %v348_v24, 2 }
 0x2c3   :  { %v346_v27 = vadd.f32 %v345_v25, %v344_v22  ;;  %v350_v30 = vadd.f32 %v349_v26, %v348_v24  ;;  %v564_v22 = vld [vmem:[%s937_s5] ss:$0 sm:$0xff]  ;;  %v529_v24 = vshrl.u32 %v361_v33, 7 }
 0x2c5   :  { %681 = vrcp.f32 %v346_v27  ;;  %v351_v31 = vrot.slane %v350_v30, 1  ;;  %vm530_vm7 = vcmp.eq.s32.totalorder %v529_v24, 0 }
 0x2c6   :  { %683 = vrcp.f32 %v334_v28  ;;  %vm532_vm9 = vmand %vm530_vm7, %vm531_vm8 }
 0x2c7   :  { %v352_v32 = vadd.f32 %v351_v31, %v350_v30 }
 0x2c9   :  { %685 = vrcp.f32 %v352_v32 }
 0x2d2   :  { %v682_v37 = vpop.eup %681 }
 0x2d3   :  { %v357_v39 = vmul.f32 %v682_v37, %v676_v11  ;;  %v684_v40 = vpop.eup %683 }
 0x2d4   :  { %v340_v44 = vmul.f32 %v684_v40, %v674_v0 }
 0x2d5   :  { %v359_v41 = vadd.f32 %v357_v39, %v339_v38 }
 0x2d6   :  { %v686_v42 = vpop.eup %685 }
 0x2d7   :  { %v364_v43 = vsel %vm363_vm4, %v359_v41, %v889_v29  ;;  %v502_v1 = vsub.f32 %v359_v41, %v861_v2  ;;  %v358_v46 = vmul.f32 %v686_v42, %v678_v16 }
 0x2d8   :  { %v366_v47 = vmul.f32 %v364_v43, %v268_v45 }
 0x2d9   :  { %v504_v48 = vmul.f32 %v502_v1, %v502_v1  ;;  %v360_v49 = vadd.f32 %v358_v46, %v340_v44 }
 0x2da   :  { %v368_v50 = vrot.slane %v366_v47, 4 }
 0x2db   :  { %508 = vrot.lane.b32.xlu1 %v504_v48, %s810_s19  ;;  %v503_v52 = vsub.f32 %v360_v49, %v863_v3  ;;  %v365_v53 = vsel %vm363_vm4, %v360_v49, %v892_v35 }
 0x2dc   :  { %v367_v54 = vmul.f32 %v365_v53, %v269_v51  ;;  %v369_v29 = vadd.f32 %v368_v50, %v366_v47 }
 0x2dd   :  { %v505_v55 = vmul.f32 %v503_v52, %v503_v52 }
 0x2de   :  { %v374_v2 = vrot.slane %v367_v54, 4  ;;  %v370_v56 = vrot.slane %v369_v29, 2 }
 0x2df   :  { %510 = vrot.lane.b32.xlu0 %v505_v55, %s810_s19 }
 0x2e0   :  { %v371_v57 = vadd.f32 %v370_v56, %v369_v29  ;;  %v375_v19 = vadd.f32 %v374_v2, %v367_v54 }
 0x2e2   :  { %v372_v45 = vrot.slane %v371_v57, 1  ;;  %v376_v58 = vrot.slane %v375_v19, 2 }
 0x2e4   :  { %v373_v59 = vadd.f32 %v372_v45, %v371_v57  ;;  %v377_v60 = vadd.f32 %v376_v58, %v375_v19 }
 0x2e6   :  { %v378_v61 = vrot.slane %v377_v60, 1  ;;  %v380_v63 = vpack.c.bf16 %v373_v59, %v373_v59 }
 0x2e8   :  { %v379_v62 = vadd.f32 %v378_v61, %v377_v60  ;;  %v407_v35 = vunpack.c.l.b16 %v380_v63 }
 0x2ea   :  { %v381_v3 = vpack.c.bf16 %v379_v62, %v379_v62 }
 0x2ec   :  { %v408_v0 = vunpack.c.l.b16 %v381_v3 }
 0x2ee   :  { %v410_v20 = vsel %vm409_vm5, %v408_v0, %v407_v35 }
 0x2ef   :  { %v411_v51 = vpack.c.b16 %v410_v20, %v410_v20 }
 0x2f1   :  { %628 = vmatmul.mubr.bf16.vlgmr.msra.gmra.mxu1 %v411_v51 }
 0x34d   :  { %v509_v4 = vpop.permute.xlu1 %508 }
 0x34e   :  { %v515_v6 = vsel %vm514_vm6, %v509_v4, 0.0 }
 0x351   :  { %v511_v5 = vpop.permute.xlu0 %510 }
 0x352   :  { %v516_v7 = vsel %vm514_vm6, %v511_v5, 0.0 }
 0x353   :  { %v517_v8 = vadd.f32 %v516_v7, %v515_v6 }
 0x355   :  { %518 = vadd.xlane.f32.xlu1 %v517_v8 }
 0x3b1   :  { %v495_v9 = vpop.f32.mrf.mxu1 }
 0x3b2   :  { %v496_v23 = vadd.f32 %v564_v22, %v495_v9 }
 0x3b3   :  { %v629_v10 = vpop.f32.mrf.mxu1 }
 0x3b4   :  { %687 = vtanh.f32 %v496_v23 }
 0x3b5   :  { %v498_v11 = vpop.f32.mrf.mxu1 }
 0x3b7   :  { %v630_v12 = vpop.f32.mrf.mxu1 }
 0x3c1   :  { %v688_v26 = vpop.eup %687 }
 0x3de   :  { %v519_v13 = vpop.xlane.xlu1 %518 }
 0x3df   :  { %v520_v14 = vrot.slane %v519_v13, 4 }
 0x3e1   :  { %v521_v15 = vadd.f32 %v520_v14, %v519_v13 }
 0x3e3   :  { %v522_v16 = vrot.slane %v521_v15, 2 }
 0x3e5   :  { %v523_v17 = vadd.f32 %v522_v16, %v521_v15 }
 0x3e7   :  { %v524_v18 = vrot.slane %v523_v17, 1 }
 0x3e9   :  { %v525_v21 = vadd.f32 %v524_v18, %v523_v17 }
 0x3eb   :  { %631 = vpush %v525_v21 }
 0x41c   :  { %s632_s22 = spop %631 }
 0x41d   :  { %s527_s23 = smul.f32 0.0625, %s632_s22 }
 0x41f   :  { %v533_v25 = vstv %s527_s23 }
 0x420   :  { %v534_v27 = vsel %vm532_vm9, %v533_v25, 0.0 }
 0x421   :  { %v535_v28 = vadd.f32 %v688_v26, %v534_v27 }
 0x423   :  { %536 = vst [vmem:[#allocation10] sm:$0x3] %v535_v28 }
 0x424   :  { %780 = shalt.err (!%p777_p10)
}
 0x425   :  { %546 = dma.vmem_to_hbm [thread:$0]  %s544_s25, 32, %s938_s6, [#allocation4]  }
 0x426   :  { %795 = dma.done.wait [#allocation4], 32  }
 0x427   :  { %796 = vsyncadd [#allocation4], 4294967264 }
 0x428   :  { %550 = vsyncpa [#allocation3], 1 }
 0x429   :  { %551 = vsyncpa [#allocation6], 1 }
 0x42a   :  { %552 = vsyncpa [#allocation9], 1 }
 0x42b   :  { %553 = vsyncpa [#allocation4], 1 }

</bundles_post_ra>
